<compile_context>
chip_gen: v6e
topology: v6e:2x2x1
jax: 0.10.0
libtpu: 0.0.40
codegen_flags: <defaults>
</compile_context>

<pallas_src>
import jax
import jax.numpy as jnp
from jax.experimental import pallas as pl
from jax.experimental.pallas import tpu as pltpu


LANE = 128
ACT_P = 64          # padded width of the action head (num_actions must be <= 64)
NEG_PAD = -1e30     # baked into padded b5 columns -> exp underflows to 0


def _round_up(n, m):
    return ((n + m - 1) // m) * m


def _cdiv(a, b):
    return -(-a // b)


# ---------------------------------------------------------------------------
# Kernel
# ---------------------------------------------------------------------------
def _distilled_kernel(x_ref,
                      w1_ref, b1_ref,
                      w2_ref, b2_ref,
                      w3_ref, b3_ref,
                      w4_ref, b4_ref,
                      w5_ref, b5_ref,
                      out_ref):
    x = x_ref[...]                                   # bf16 [TB, in_p]

    def hidden(h, w_ref, b_ref):
        # MXU matmul in bf16 with f32 accumulation; bias + ReLU in f32 (VPU);
        # cast back to bf16 for the next MXU push.
        y = jnp.dot(h, w_ref[...], preferred_element_type=jnp.float32) + b_ref[...]
        return jnp.maximum(y, 0.0).astype(x.dtype)

    h = hidden(x, w1_ref, b1_ref)
    h = hidden(h, w2_ref, b2_ref)
    h = hidden(h, w3_ref, b3_ref)
    h = hidden(h, w4_ref, b4_ref)

    # Action head: [TB, 64] f32. Padded columns carry -1e30 from b5, so the
    # softmax needs no explicit mask (exp underflows to exactly 0 there).
    logits = jnp.dot(h, w5_ref[...], preferred_element_type=jnp.float32) + b5_ref[...]

    m = jnp.max(logits, axis=-1, keepdims=True)
    e = jnp.exp(logits - m)
    probs = e / jnp.sum(e, axis=-1, keepdims=True)   # exact normalization

    # Single lane-dense [TB, 128] output slab: probs | logits.
    out_ref[...] = jnp.concatenate([probs, logits], axis=-1)


# ---------------------------------------------------------------------------
# Parameter packing (hidden dims -> 128 lanes, action head -> 64 lanes,
# MXU operands cast to bf16, -1e30 baked into padded b5 columns)
# ---------------------------------------------------------------------------
def pack_params(params, input_size, num_actions, mxu_dtype=jnp.bfloat16):
    assert num_actions <= ACT_P, "num_actions must be <= 64 for the packed output slab"
    in_p = _round_up(input_size, 8)
    dims = [input_size, 64, 128, 128, 64, num_actions]
    dims_p = [in_p, 128, 128, 128, 128, ACT_P]
    packed = {}
    for i in range(1, 6):
        fan_in, fan_out = dims[i - 1], dims[i]
        ip, op = dims_p[i - 1], dims_p[i]
        w = jnp.zeros((ip, op), jnp.float32).at[:fan_in, :fan_out].set(params[f"w{i}"])
        pad_fill = NEG_PAD if i == 5 else 0.0
        b = jnp.full((1, op), pad_fill, jnp.float32).at[:, :fan_out].set(params[f"b{i}"])
        packed[f"w{i}"] = w.astype(mxu_dtype)        # bf16 on the MXU
        packed[f"b{i}"] = b                          # bias stays f32
    return packed


# ---------------------------------------------------------------------------
# Host wrapper
# ---------------------------------------------------------------------------
def _choose_tile(B, tb_max):
    n_steps = _cdiv(B, tb_max)
    # v7x: keep >= 2 grid steps for large batches so the "parallel" axis can
    # shard across both TensorCores (harmless on v5e/v6e).
    if B >= 1024 and n_steps < 2:
        n_steps = 2
    tb = _round_up(_cdiv(B, n_steps), 8)   # minimize tail-tile padding
    b_pad = tb * n_steps
    return tb, b_pad


def distilled_forward(x, packed, num_actions, *, tb_max=1024):
    """x: [B, input_size] f32.  packed: dict from pack_params()."""
    B, in_size = x.shape
    in_p = packed["w1"].shape[0]

    tb, b_pad = _choose_tile(B, tb_max)

    # Input stays near-unpadded in the feature dim (block last dim == full dim).
    xp = jnp.zeros((b_pad, in_p), jnp.bfloat16).at[:B, :in_size].set(
        x.astype(jnp.bfloat16))

    flat_args = [xp]
    in_specs = [pl.BlockSpec((tb, in_p), lambda s: (s, 0))]
    for i in range(1, 6):
        w, b = packed[f"w{i}"], packed[f"b{i}"]
        flat_args += [w, b]
        # Constant index maps -> weights/biases resident in VMEM across steps.
        in_specs += [pl.BlockSpec(w.shape, lambda s: (0, 0)),
                     pl.BlockSpec(b.shape, lambda s: (0, 0))]

    out = pl.pallas_call(
        _distilled_kernel,
        out_shape=jax.ShapeDtypeStruct((b_pad, 2 * ACT_P), jnp.float32),
        grid=(b_pad // tb,),
        in_specs=in_specs,
        out_specs=pl.BlockSpec((tb, 2 * ACT_P), lambda s: (s, 0)),
        compiler_params=pltpu.CompilerParams(
            dimension_semantics=("parallel",)),
    )(*flat_args)

    # Slice the packed slab apart (free layout plumbing in the wrapper).
    probs = out[:B, :num_actions]
    logits = out[:B, ACT_P:ACT_P + num_actions]
    return probs, logits


# ---------------------------------------------------------------------------
# Init + references
# ---------------------------------------------------------------------------
def init_params(key, input_size, num_actions):
    """Deterministic synthetic init (PyTorch-like uniform fan-in scaling)."""
    sizes = [(input_size, 64), (64, 128), (128, 128), (128, 64),
             (64, num_actions)]
    params = {}
    for i, (fan_in, fan_out) in enumerate(sizes, start=1):
        key, kw, kb = jax.random.split(key, 3)
        bound = 1.0 / jnp.sqrt(float(fan_in))
        # stored as [in, out] (transpose of torch's [out, in]); bias as [1, out]
        params[f"w{i}"] = jax.random.uniform(
            kw, (fan_in, fan_out), jnp.float32, -bound, bound)
        params[f"b{i}"] = jax.random.uniform(
            kb, (1, fan_out), jnp.float32, -bound, bound)
    return params


def reference_forward_f32(x, params):
    h = x
    for i in range(1, 5):
        h = jnp.maximum(h @ params[f"w{i}"] + params[f"b{i}"], 0.0)
    logits = h @ params["w5"] + params["b5"]
    return jax.nn.softmax(logits, axis=-1), logits


def reference_forward_bf16(x, params):
    """Same bf16-MXU / f32-accumulate recipe as the kernel (tight check)."""
    h = x.astype(jnp.bfloat16)
    for i in range(1, 5):
        w = params[f"w{i}"].astype(jnp.bfloat16)
        y = jnp.dot(h, w, preferred_element_type=jnp.float32) + params[f"b{i}"]
        h = jnp.maximum(y, 0.0).astype(jnp.bfloat16)
    w5 = params["w5"].astype(jnp.bfloat16)
    logits = jnp.dot(h, w5, preferred_element_type=jnp.float32) + params["b5"]
    return jax.nn.softmax(logits, axis=-1), logits


# ---------------------------------------------------------------------------
# TODO(synk): the module's saved_actions / action_pref / pi_prob lists and any
# Categorical sampling are host-side training bookkeeping, not part of forward.
if __name__ == "__main__":
    key = jax.random.PRNGKey(0)
    batch, input_size, num_actions, num_tasks = 8, 32, 6, 3

    kx, kp = jax.random.split(key)
    x = jax.random.normal(kx, (batch, input_size), jnp.float32)
    params = init_params(kp, input_size, num_actions)
    packed = pack_params(params, input_size, num_actions)

    probs, prefs = distilled_forward(x, packed, num_actions)
    jax.block_until_ready((probs, prefs))

    # Tight check against a reference using the identical bf16-MXU recipe.
    mp, ml = reference_forward_bf16(x, params)
    assert jnp.allclose(prefs, ml, atol=2e-3, rtol=2e-3)
    assert jnp.allclose(probs, mp, atol=2e-3, rtol=2e-3)

    # Loose check against the pure-f32 reference (bf16 weight rounding).
    rp, rl = reference_forward_f32(x, params)
    assert jnp.allclose(prefs, rl, atol=5e-2, rtol=5e-2)
    assert jnp.allclose(probs, rp, atol=5e-2, rtol=5e-2)

    # Exact normalization (softmax uses exact division in the kernel).
    assert jnp.allclose(jnp.sum(probs, axis=-1), 1.0, atol=1e-4)

    print("KERNEL_OK")
</pallas_src>

<mosaic_0001>
module attributes {stable_mosaic.version = 11 : i64} {
  func.func @_distilled_kernel(%arg0: i32, %arg1: memref<8x32xbf16, #tpu.memory_space<vmem>>, %arg2: memref<32x128xbf16, #tpu.memory_space<vmem>>, %arg3: memref<1x128xf32, #tpu.memory_space<vmem>>, %arg4: memref<128x128xbf16, #tpu.memory_space<vmem>>, %arg5: memref<1x128xf32, #tpu.memory_space<vmem>>, %arg6: memref<128x128xbf16, #tpu.memory_space<vmem>>, %arg7: memref<1x128xf32, #tpu.memory_space<vmem>>, %arg8: memref<128x128xbf16, #tpu.memory_space<vmem>>, %arg9: memref<1x128xf32, #tpu.memory_space<vmem>>, %arg10: memref<128x64xbf16, #tpu.memory_space<vmem>>, %arg11: memref<1x64xf32, #tpu.memory_space<vmem>>, %arg12: memref<8x128xf32, #tpu.memory_space<vmem>>) attributes {dimension_semantics = [#tpu.dimension_semantics<parallel>], iteration_bounds = array<i64: 1>, scalar_prefetch = 0 : i64, scratch_operands = 0 : i64, tpu.core_type = #tpu.core_type<tc>, window_params = [{transform_indices = @transform_0, window_bounds = array<i64: 8, 32>}, {pipeline_mode = #tpu.pipeline_mode<synchronous>, transform_indices = @transform_1, window_bounds = array<i64: 32, 128>}, {pipeline_mode = #tpu.pipeline_mode<synchronous>, transform_indices = @transform_2, window_bounds = array<i64: 1, 128>}, {pipeline_mode = #tpu.pipeline_mode<synchronous>, transform_indices = @transform_3, window_bounds = array<i64: 128, 128>}, {pipeline_mode = #tpu.pipeline_mode<synchronous>, transform_indices = @transform_4, window_bounds = array<i64: 1, 128>}, {pipeline_mode = #tpu.pipeline_mode<synchronous>, transform_indices = @transform_5, window_bounds = array<i64: 128, 128>}, {pipeline_mode = #tpu.pipeline_mode<synchronous>, transform_indices = @transform_6, window_bounds = array<i64: 1, 128>}, {pipeline_mode = #tpu.pipeline_mode<synchronous>, transform_indices = @transform_7, window_bounds = array<i64: 128, 128>}, {pipeline_mode = #tpu.pipeline_mode<synchronous>, transform_indices = @transform_8, window_bounds = array<i64: 1, 128>}, {pipeline_mode = #tpu.pipeline_mode<synchronous>, transform_indices = @transform_9, window_bounds = array<i64: 128, 64>}, {pipeline_mode = #tpu.pipeline_mode<synchronous>, transform_indices = @transform_10, window_bounds = array<i64: 1, 64>}, {transform_indices = @transform_11, window_bounds = array<i64: 8, 128>}]} {
    %c0 = arith.constant 0 : index
    %c0_0 = arith.constant 0 : index
    %0 = vector.load %arg1[%c0, %c0_0] : memref<8x32xbf16, #tpu.memory_space<vmem>>, vector<8x32xbf16>
    %c0_1 = arith.constant 0 : index
    %c0_2 = arith.constant 0 : index
    %1 = vector.load %arg2[%c0_1, %c0_2] : memref<32x128xbf16, #tpu.memory_space<vmem>>, vector<32x128xbf16>
    %cst = arith.constant dense<0.000000e+00> : vector<8x128xf32>
    %2 = tpu.matmul %0, %1, %cst {dimension_numbers = #tpu.dot_dimension_numbers<[1], [0], [0], [1], [0, 0, 1, 1], [], []>} : vector<8x32xbf16>, vector<32x128xbf16>, vector<8x128xf32> -> vector<8x128xf32>
    %c0_3 = arith.constant 0 : index
    %c0_4 = arith.constant 0 : index
    %3 = vector.load %arg3[%c0_3, %c0_4] : memref<1x128xf32, #tpu.memory_space<vmem>>, vector<1x128xf32>
    %4 = vector.broadcast %3 : vector<1x128xf32> to vector<8x128xf32>
    %5 = arith.addf %2, %4 : vector<8x128xf32>
    %cst_5 = arith.constant 0.000000e+00 : f32
    %6 = vector.broadcast %cst_5 : f32 to vector<8x128xf32>
    %7 = arith.maximumf %5, %6 : vector<8x128xf32>
    %8 = arith.truncf %7 : vector<8x128xf32> to vector<8x128xbf16>
    %c0_6 = arith.constant 0 : index
    %c0_7 = arith.constant 0 : index
    %9 = vector.load %arg4[%c0_6, %c0_7] : memref<128x128xbf16, #tpu.memory_space<vmem>>, vector<128x128xbf16>
    %cst_8 = arith.constant dense<0.000000e+00> : vector<8x128xf32>
    %10 = tpu.matmul %8, %9, %cst_8 {dimension_numbers = #tpu.dot_dimension_numbers<[1], [0], [0], [1], [0, 0, 1, 1], [], []>} : vector<8x128xbf16>, vector<128x128xbf16>, vector<8x128xf32> -> vector<8x128xf32>
    %c0_9 = arith.constant 0 : index
    %c0_10 = arith.constant 0 : index
    %11 = vector.load %arg5[%c0_9, %c0_10] : memref<1x128xf32, #tpu.memory_space<vmem>>, vector<1x128xf32>
    %12 = vector.broadcast %11 : vector<1x128xf32> to vector<8x128xf32>
    %13 = arith.addf %10, %12 : vector<8x128xf32>
    %cst_11 = arith.constant 0.000000e+00 : f32
    %14 = vector.broadcast %cst_11 : f32 to vector<8x128xf32>
    %15 = arith.maximumf %13, %14 : vector<8x128xf32>
    %16 = arith.truncf %15 : vector<8x128xf32> to vector<8x128xbf16>
    %c0_12 = arith.constant 0 : index
    %c0_13 = arith.constant 0 : index
    %17 = vector.load %arg6[%c0_12, %c0_13] : memref<128x128xbf16, #tpu.memory_space<vmem>>, vector<128x128xbf16>
    %cst_14 = arith.constant dense<0.000000e+00> : vector<8x128xf32>
    %18 = tpu.matmul %16, %17, %cst_14 {dimension_numbers = #tpu.dot_dimension_numbers<[1], [0], [0], [1], [0, 0, 1, 1], [], []>} : vector<8x128xbf16>, vector<128x128xbf16>, vector<8x128xf32> -> vector<8x128xf32>
    %c0_15 = arith.constant 0 : index
    %c0_16 = arith.constant 0 : index
    %19 = vector.load %arg7[%c0_15, %c0_16] : memref<1x128xf32, #tpu.memory_space<vmem>>, vector<1x128xf32>
    %20 = vector.broadcast %19 : vector<1x128xf32> to vector<8x128xf32>
    %21 = arith.addf %18, %20 : vector<8x128xf32>
    %cst_17 = arith.constant 0.000000e+00 : f32
    %22 = vector.broadcast %cst_17 : f32 to vector<8x128xf32>
    %23 = arith.maximumf %21, %22 : vector<8x128xf32>
    %24 = arith.truncf %23 : vector<8x128xf32> to vector<8x128xbf16>
    %c0_18 = arith.constant 0 : index
    %c0_19 = arith.constant 0 : index
    %25 = vector.load %arg8[%c0_18, %c0_19] : memref<128x128xbf16, #tpu.memory_space<vmem>>, vector<128x128xbf16>
    %cst_20 = arith.constant dense<0.000000e+00> : vector<8x128xf32>
    %26 = tpu.matmul %24, %25, %cst_20 {dimension_numbers = #tpu.dot_dimension_numbers<[1], [0], [0], [1], [0, 0, 1, 1], [], []>} : vector<8x128xbf16>, vector<128x128xbf16>, vector<8x128xf32> -> vector<8x128xf32>
    %c0_21 = arith.constant 0 : index
    %c0_22 = arith.constant 0 : index
    %27 = vector.load %arg9[%c0_21, %c0_22] : memref<1x128xf32, #tpu.memory_space<vmem>>, vector<1x128xf32>
    %28 = vector.broadcast %27 : vector<1x128xf32> to vector<8x128xf32>
    %29 = arith.addf %26, %28 : vector<8x128xf32>
    %cst_23 = arith.constant 0.000000e+00 : f32
    %30 = vector.broadcast %cst_23 : f32 to vector<8x128xf32>
    %31 = arith.maximumf %29, %30 : vector<8x128xf32>
    %32 = arith.truncf %31 : vector<8x128xf32> to vector<8x128xbf16>
    %c0_24 = arith.constant 0 : index
    %c0_25 = arith.constant 0 : index
    %33 = vector.load %arg10[%c0_24, %c0_25] : memref<128x64xbf16, #tpu.memory_space<vmem>>, vector<128x64xbf16>
    %cst_26 = arith.constant dense<0.000000e+00> : vector<8x64xf32>
    %34 = tpu.matmul %32, %33, %cst_26 {dimension_numbers = #tpu.dot_dimension_numbers<[1], [0], [0], [1], [0, 0, 1, 1], [], []>} : vector<8x128xbf16>, vector<128x64xbf16>, vector<8x64xf32> -> vector<8x64xf32>
    %c0_27 = arith.constant 0 : index
    %c0_28 = arith.constant 0 : index
    %35 = vector.load %arg11[%c0_27, %c0_28] : memref<1x64xf32, #tpu.memory_space<vmem>>, vector<1x64xf32>
    %36 = vector.broadcast %35 : vector<1x64xf32> to vector<8x64xf32>
    %37 = arith.addf %34, %36 : vector<8x64xf32>
    %cst_29 = arith.constant dense<0xFF800000> : vector<8xf32>
    %38 = vector.multi_reduction <maximumf>, %37, %cst_29 [1] : vector<8x64xf32> to vector<8xf32>
    %39 = vector.shape_cast %38 : vector<8xf32> to vector<8x1xf32>
    %40 = vector.broadcast %39 : vector<8x1xf32> to vector<8x64xf32>
    %41 = arith.subf %37, %40 : vector<8x64xf32>
    %42 = math.exp %41 : vector<8x64xf32>
    %cst_30 = arith.constant dense<0.000000e+00> : vector<8xf32>
    %43 = vector.multi_reduction <add>, %42, %cst_30 [1] : vector<8x64xf32> to vector<8xf32>
    %44 = vector.shape_cast %43 : vector<8xf32> to vector<8x1xf32>
    %45 = vector.broadcast %44 : vector<8x1xf32> to vector<8x64xf32>
    %46 = arith.divf %42, %45 : vector<8x64xf32>
    %47 = tpu.concatenate %46, %37 in 1 : vector<8x64xf32>, vector<8x64xf32> -> vector<8x128xf32>
    %c0_31 = arith.constant 0 : index
    %c0_32 = arith.constant 0 : index
    %48 = vector.load %arg12[%c0_31, %c0_32] : memref<8x128xf32, #tpu.memory_space<vmem>>, vector<8x128xf32>
    tpu.vector_store %arg12[%c0_31, %c0_32], %47 {strides = array<i32>} : memref<8x128xf32, #tpu.memory_space<vmem>>, vector<8x128xf32>,
    return
  }
  func.func @transform_0(%arg0: i32) -> (i32, i32) {
    %c0_i32 = arith.constant 0 : i32
    %c0_i32_0 = arith.constant 0 : i32
    return %arg0, %c0_i32 : i32, i32
  }
  func.func @transform_1(%arg0: i32) -> (i32, i32) {
    %c0_i32 = arith.constant 0 : i32
    %c0_i32_0 = arith.constant 0 : i32
    %c0_i32_1 = arith.constant 0 : i32
    return %c0_i32, %c0_i32_0 : i32, i32
  }
  func.func @transform_2(%arg0: i32) -> (i32, i32) {
    %c0_i32 = arith.constant 0 : i32
    %c0_i32_0 = arith.constant 0 : i32
    %c0_i32_1 = arith.constant 0 : i32
    return %c0_i32, %c0_i32_0 : i32, i32
  }
  func.func @transform_3(%arg0: i32) -> (i32, i32) {
    %c0_i32 = arith.constant 0 : i32
    %c0_i32_0 = arith.constant 0 : i32
    %c0_i32_1 = arith.constant 0 : i32
    return %c0_i32, %c0_i32_0 : i32, i32
  }
  func.func @transform_4(%arg0: i32) -> (i32, i32) {
    %c0_i32 = arith.constant 0 : i32
    %c0_i32_0 = arith.constant 0 : i32
    %c0_i32_1 = arith.constant 0 : i32
    return %c0_i32, %c0_i32_0 : i32, i32
  }
  func.func @transform_5(%arg0: i32) -> (i32, i32) {
    %c0_i32 = arith.constant 0 : i32
    %c0_i32_0 = arith.constant 0 : i32
    %c0_i32_1 = arith.constant 0 : i32
    return %c0_i32, %c0_i32_0 : i32, i32
  }
  func.func @transform_6(%arg0: i32) -> (i32, i32) {
    %c0_i32 = arith.constant 0 : i32
    %c0_i32_0 = arith.constant 0 : i32
    %c0_i32_1 = arith.constant 0 : i32
    return %c0_i32, %c0_i32_0 : i32, i32
  }
  func.func @transform_7(%arg0: i32) -> (i32, i32) {
    %c0_i32 = arith.constant 0 : i32
    %c0_i32_0 = arith.constant 0 : i32
    %c0_i32_1 = arith.constant 0 : i32
    return %c0_i32, %c0_i32_0 : i32, i32
  }
  func.func @transform_8(%arg0: i32) -> (i32, i32) {
    %c0_i32 = arith.constant 0 : i32
    %c0_i32_0 = arith.constant 0 : i32
    %c0_i32_1 = arith.constant 0 : i32
    return %c0_i32, %c0_i32_0 : i32, i32
  }
  func.func @transform_9(%arg0: i32) -> (i32, i32) {
    %c0_i32 = arith.constant 0 : i32
    %c0_i32_0 = arith.constant 0 : i32
    %c0_i32_1 = arith.constant 0 : i32
    return %c0_i32, %c0_i32_0 : i32, i32
  }
  func.func @transform_10(%arg0: i32) -> (i32, i32) {
    %c0_i32 = arith.constant 0 : i32
    %c0_i32_0 = arith.constant 0 : i32
    %c0_i32_1 = arith.constant 0 : i32
    return %c0_i32, %c0_i32_0 : i32, i32
  }
  func.func @transform_11(%arg0: i32) -> (i32, i32) {
    %c0_i32 = arith.constant 0 : i32
    %c0_i32_0 = arith.constant 0 : i32
    return %arg0, %c0_i32 : i32, i32
  }
}

</mosaic_0001>

<bundles_post_ra>
// kernel: tpu_custom_call.1
= control target key start
LH: loop header
LB: loop body
LE: loop exit
PB: predicated region body
PF: predicated region fallthrough
CT: control target
= control target key end

     0   :  { %16 = vsyncpa [#allocation3], 0  ;;  %s1100_s0 = inlined_call_operand.vmem [shape: bf16[8,32], index: 0, kind: input, shape index: {}]   ;;  %s1101_s1 = inlined_call_operand.vmem [shape: bf16[32,128], index: 1, kind: input, shape index: {}]   ;;  %s1102_s2 = inlined_call_operand.vmem [shape: f32[1,128], index: 2, kind: input, shape index: {}]   ;;  %s1103_s3 = inlined_call_operand.vmem [shape: bf16[128,128], index: 3, kind: input, shape index: {}]   ;;  %s1104_s4 = inlined_call_operand.vmem [shape: f32[1,128], index: 4, kind: input, shape index: {}]   ;;  %s1105_s5 = inlined_call_operand.hbm [shape: bf16[128,128], index: 5, kind: input, shape index: {}]   ;;  %s1106_s6 = inlined_call_operand.vmem [shape: f32[1,128], index: 6, kind: input, shape index: {}]   ;;  %s1107_s7 = inlined_call_operand.hbm [shape: bf16[128,128], index: 7, kind: input, shape index: {}]   ;;  %s1108_s8 = inlined_call_operand.vmem [shape: f32[1,128], index: 8, kind: input, shape index: {}]   ;;  %s1109_s9 = inlined_call_operand.vmem [shape: bf16[128,64], index: 9, kind: input, shape index: {}]   ;;  %s1110_s10 = inlined_call_operand.vmem [shape: f32[1,64], index: 10, kind: input, shape index: {}]   ;;  %s1111_s11 = inlined_call_operand.hbm [shape: f32[8,128], index: 11, kind: output, shape index: {}]  }
   0x1   :  { %17 = vsyncpa [#allocation6], 0 }
   0x2   :  { %18 = vsyncpa [#allocation4], 0  ;;  %s900_s17 = smov [#allocation2]  }
   0x3   :  { %s34_s18 = sshll.u32 %s900_s17, 4  ;;  %s35_s18 = int_to_ptr.vmem [resolvable:$true] %s34_s18 }
   0x4   :  { %s842_s19 = scalar_lea.vmem %s35_s18, 1024  ;;  %p847_p1 = scmp.lt.s32.totalorder %s35_s18, %s35_s18 }
   0x5   :  { %p843_p0 = scmp.ne.s32.totalorder %s35_s18, %s842_s19  ;;  %p848_p2 = scmp.lt.s32.totalorder %s842_s19, %s842_s19 }
   0x7   :  { %p849_p3 = por %p848_p2, %p847_p1 }
   0x9   :  { %p850_p4 = pnand %p849_p3, %p843_p0 }
   0xb   :  { %853 = shalt.err (!%p850_p4)
}
   0xc   :  { %s901_s20 = smov 64   ;;  %s902_s21 = smov 4  }
   0xd   :  { %40 = dma.hbm_to_vmem [thread:$0]  %s1105_s5, 1024, %s35_s18, [#allocation3], %s901_s20, %s901_s20, %s902_s21  }
   0xe   :  { %s903_s24 = smov [#allocation5]  }
   0xf   :  { %s48_s25 = sshll.u32 %s903_s24, 4  ;;  %s49_s25 = int_to_ptr.vmem [resolvable:$true] %s48_s25 }
  0x10   :  { %s862_s26 = scalar_lea.vmem %s49_s25, 1024  ;;  %p867_p6 = scmp.lt.s32.totalorder %s49_s25, %s49_s25 }
  0x11   :  { %p863_p5 = scmp.ne.s32.totalorder %s49_s25, %s862_s26  ;;  %p868_p7 = scmp.lt.s32.totalorder %s862_s26, %s862_s26 }
  0x13   :  { %p869_p8 = por %p868_p7, %p867_p6 }
  0x15   :  { %p870_p9 = pnand %p869_p8, %p863_p5 }
  0x17   :  { %873 = shalt.err (!%p870_p9)
}
  0x18   :  { %54 = dma.hbm_to_vmem [thread:$0]  %s1107_s7, 1024, %s49_s25, [#allocation6], %s901_s20, %s901_s20, %s902_s21  }
  0x19   :  { %894 = dma.done.wait [#allocation3], 1024  }
  0x1a   :  { %895 = vsyncadd [#allocation3], 4294966272 }
  0x1b   :  { %896 = dma.done.wait [#allocation6], 1024  }
  0x1c   :  { %897 = vsyncadd [#allocation6], 4294966272  ;;  %v904_v0 = vmov 0.0   ;;  %vm905_vm0 = vmmov 0   ;;  %v796_v1 = vld [vmem:[%s1101_s1 + $0x8] sm:$0xff]   ;;  %v797_v2 = vld [vmem:[%s1101_s1] sm:$0xff]  }
  0x1d   :  { %701 = vmatprep.subr.bf16.mxu0 %v904_v0  ;;  %705 = vmatprep.mubr.msk.bf16.mxu0 %vm905_vm0, %v904_v0  ;;  %v798_v3 = vld [vmem:[%s1103_s3 + $0x38] sm:$0xff]   ;;  %vm92_vm1 = vcmask 261120   ;;  %v799_v4 = vld [vmem:[%s1103_s3 + $0x30] sm:$0xff]   ;;  %v68_v5 = vld [vmem:[%s1100_s0] sm:$0xf]  ;;  %vm588_vm2 = vcmask 523264  }
  0x1e   :  { %709 = vmatprep.subr.bf16.mxu1 %v904_v0  ;;  %725 = vmatprep.mubr.msk.bf16.mxu1 %vm905_vm0, %v904_v0  ;;  %v800_v6 = vld [vmem:[%s1103_s3 + $0x28] sm:$0xff]   ;;  %v801_v7 = vld [vmem:[%s1103_s3 + $0x20] sm:$0xff]   ;;  %v802_v8 = vld [vmem:[%s1103_s3 + $0x18] sm:$0xff]  }
  0x1f   :  { %702 = vmatpush3.bf16.msra.mxu0 %v796_v1  ;;  %710 = vmatpush3.bf16.msra.mxu1 %v798_v3  ;;  %v803_v9 = vld [vmem:[%s1103_s3 + $0x10] sm:$0xff]   ;;  %v804_v10 = vld [vmem:[%s1103_s3 + $0x8] sm:$0xff]   ;;  %v805_v11 = vld [vmem:[%s1103_s3] sm:$0xff]  }
  0x20   :  { %703 = vmatprep.subr.bf16.mxu0 %v904_v0  ;;  %711 = vmatprep.subr.bf16.mxu1 %v904_v0  ;;  %v806_v12 = vld [vmem:[#allocation2 + $0x38] sm:$0xff]   ;;  %v807_v13 = vld [vmem:[#allocation2 + $0x30] sm:$0xff]   ;;  %v808_v14 = vld [vmem:[#allocation2 + $0x28] sm:$0xff]  }
  0x21   :  { %v809_v15 = vld [vmem:[#allocation2 + $0x20] sm:$0xff]   ;;  %v810_v16 = vld [vmem:[#allocation2 + $0x18] sm:$0xff]   ;;  %v811_v17 = vld [vmem:[#allocation2 + $0x10] sm:$0xff]  }
  0x22   :  { %v622_v18 = vld [vmem:[%s1102_s2] ss:$0 sm:$0xff]  ;;  %v812_v26 = vld [vmem:[#allocation2 + $0x8] sm:$0xff]   ;;  %v814_v28 = vld [vmem:[#allocation5 + $0x38] sm:$0xff]  }
  0x23   :  { %704 = vmatpush3.bf16.msra.mxu0 %v797_v2  ;;  %712 = vmatpush3.bf16.msra.mxu1 %v799_v4  ;;  %v813_v27 = vld [vmem:[#allocation2] sm:$0xff]   ;;  %v815_v29 = vld [vmem:[#allocation5 + $0x30] sm:$0xff]   ;;  %v816_v30 = vld [vmem:[#allocation5 + $0x28] sm:$0xff]  }
  0x24   :  { %729 = vmatprep.subr.bf16.mxu0 %v904_v0  ;;  %713 = vmatprep.subr.bf16.mxu1 %v904_v0  ;;  %v817_v31 = vld [vmem:[#allocation5 + $0x20] sm:$0xff]   ;;  %v818_v32 = vld [vmem:[#allocation5 + $0x18] sm:$0xff]   ;;  %v819_v33 = vld [vmem:[#allocation5 + $0x10] sm:$0xff]  }
  0x25   :  { %v626_v34 = vld [vmem:[%s1104_s4] ss:$0 sm:$0xff]  ;;  %v820_v42 = vld [vmem:[#allocation5 + $0x8] sm:$0xff]   ;;  %v822_v44 = vld [vmem:[%s1109_s9 + $0x38] sm:$0xff]  }
  0x26   :  { %706 = vmatmul.mubr.msk.bf16.vlgmr.msra.gmra.mxu0 %vm92_vm1, %v68_v5  ;;  %v821_v43 = vld [vmem:[#allocation5] sm:$0xff]   ;;  %v823_v45 = vld [vmem:[%s1109_s9 + $0x30] sm:$0xff]   ;;  %v824_v46 = vld [vmem:[%s1109_s9 + $0x28] sm:$0xff]  }
  0x27   :  { %745 = vmatprep.mubr.msk.bf16.mxu0 %vm905_vm0, %v904_v0  ;;  %714 = vmatpush3.bf16.msra.mxu1 %v800_v6  ;;  %v825_v47 = vld [vmem:[%s1109_s9 + $0x20] sm:$0xff]   ;;  %v826_v48 = vld [vmem:[%s1109_s9 + $0x18] sm:$0xff]   ;;  %v827_v49 = vld [vmem:[%s1109_s9 + $0x10] sm:$0xff]  }
  0x28   :  { %715 = vmatprep.subr.bf16.mxu1 %v904_v0  ;;  %730 = vmatpush3.bf16.msra.mxu0 %v806_v12  ;;  %v635_v50 = vld [vmem:[%s1106_s6] ss:$0 sm:$0xff]  ;;  %v828_v58 = vld [vmem:[%s1109_s9 + $0x8] sm:$0xff]  }
  0x29   :  { %731 = vmatprep.subr.bf16.mxu0 %v904_v0  ;;  %v829_v59 = vld [vmem:[%s1109_s9] sm:$0xff]  }
  0x2a   :  { %v644_v60 = vld [vmem:[%s1108_s8] ss:$0 sm:$0xff]  ;;  %s906_s8 = smov [#allocation7]  }
  0x2b   :  { %716 = vmatpush3.bf16.msra.mxu1 %v801_v7  ;;  %s612_s9 = sshll.u32 %s906_s8, 4  ;;  %s613_s9 = int_to_ptr.vmem [resolvable:$true] %s612_s9 }
  0x2c   :  { %717 = vmatprep.subr.bf16.mxu1 %v904_v0  ;;  %732 = vmatpush3.bf16.msra.mxu0 %v807_v13  ;;  %p879_p11 = scmp.lt.s32.totalorder %s613_s9, %s613_s9 }
  0x2d   :  { %733 = vmatprep.subr.bf16.mxu0 %v904_v0 }
  0x2f   :  { %718 = vmatpush3.bf16.msra.mxu1 %v802_v8 }
  0x30   :  { %719 = vmatprep.subr.bf16.mxu1 %v904_v0  ;;  %734 = vmatpush3.bf16.msra.mxu0 %v808_v14 }
  0x31   :  { %735 = vmatprep.subr.bf16.mxu0 %v904_v0 }
  0x33   :  { %720 = vmatpush3.bf16.msra.mxu1 %v803_v9 }
  0x34   :  { %721 = vmatprep.subr.bf16.mxu1 %v904_v0  ;;  %736 = vmatpush3.bf16.msra.mxu0 %v809_v15 }
  0x35   :  { %737 = vmatprep.subr.bf16.mxu0 %v904_v0 }
  0x37   :  { %722 = vmatpush3.bf16.msra.mxu1 %v804_v10 }
  0x38   :  { %723 = vmatprep.subr.bf16.mxu1 %v904_v0  ;;  %738 = vmatpush3.bf16.msra.mxu0 %v810_v16 }
  0x39   :  { %739 = vmatprep.subr.bf16.mxu0 %v904_v0 }
  0x3b   :  { %724 = vmatpush3.bf16.msra.mxu1 %v805_v11 }
  0x3c   :  { %749 = vmatprep.subr.bf16.mxu1 %v904_v0  ;;  %740 = vmatpush3.bf16.msra.mxu0 %v811_v17 }
  0x3d   :  { %741 = vmatprep.subr.bf16.mxu0 %v904_v0 }
  0x40   :  { %742 = vmatpush3.bf16.msra.mxu0 %v812_v26 }
  0x41   :  { %743 = vmatprep.subr.bf16.mxu0 %v904_v0 }
  0x44   :  { %744 = vmatpush3.bf16.msra.mxu0 %v813_v27 }
  0x45   :  { %769 = vmatprep.subr.bf16.mxu0 %v904_v0 }
  0xe6   :  { %v130_v19 = vpop.f32.mrf.mxu0 }
  0xe7   :  { %v131_v20 = vadd.f32 %v622_v18, %v130_v19 }
  0xe8   :  { %v707_v21 = vpop.f32.mrf.mxu0 }
  0xe9   :  { %v136_v22 = vmax.f32 %v131_v20, 0.0 }
  0xea   :  { %v133_v23 = vpop.f32.mrf.mxu0 }
  0xeb   :  { %v137_v24 = vpack.c.bf16 %v136_v22, %v136_v22 }
  0xec   :  { %v708_v25 = vpop.f32.mrf.mxu0 }
  0xed   :  { %726 = vmatmul.mubr.bf16.vlgmr.msra.gmra.mxu1 %v137_v24 }
  0xee   :  { %765 = vmatprep.mubr.msk.bf16.mxu1 %vm905_vm0, %v904_v0  ;;  %750 = vmatpush3.bf16.msra.mxu1 %v814_v28 }
  0xef   :  { %751 = vmatprep.subr.bf16.mxu1 %v904_v0 }
  0xf2   :  { %752 = vmatpush3.bf16.msra.mxu1 %v815_v29 }
  0xf3   :  { %753 = vmatprep.subr.bf16.mxu1 %v904_v0 }
  0xf6   :  { %754 = vmatpush3.bf16.msra.mxu1 %v816_v30 }
  0xf7   :  { %755 = vmatprep.subr.bf16.mxu1 %v904_v0 }
  0xfa   :  { %756 = vmatpush3.bf16.msra.mxu1 %v817_v31 }
  0xfb   :  { %757 = vmatprep.subr.bf16.mxu1 %v904_v0 }
  0xfe   :  { %758 = vmatpush3.bf16.msra.mxu1 %v818_v32 }
  0xff   :  { %759 = vmatprep.subr.bf16.mxu1 %v904_v0 }
 0x102   :  { %760 = vmatpush3.bf16.msra.mxu1 %v819_v33 }
 0x103   :  { %761 = vmatprep.subr.bf16.mxu1 %v904_v0 }
 0x106   :  { %762 = vmatpush3.bf16.msra.mxu1 %v820_v42 }
 0x107   :  { %763 = vmatprep.subr.bf16.mxu1 %v904_v0 }
 0x10a   :  { %764 = vmatpush3.bf16.msra.mxu1 %v821_v43 }
 0x1ad   :  { %v243_v35 = vpop.f32.mrf.mxu1 }
 0x1ae   :  { %v244_v36 = vadd.f32 %v626_v34, %v243_v35 }
 0x1af   :  { %v727_v37 = vpop.f32.mrf.mxu1 }
 0x1b0   :  { %v249_v38 = vmax.f32 %v244_v36, 0.0 }
 0x1b1   :  { %v246_v39 = vpop.f32.mrf.mxu1 }
 0x1b2   :  { %v250_v40 = vpack.c.bf16 %v249_v38, %v249_v38 }
 0x1b3   :  { %v728_v41 = vpop.f32.mrf.mxu1 }
 0x1b4   :  { %746 = vmatmul.mubr.bf16.vlgmr.msra.gmra.mxu0 %v250_v40 }
 0x1b5   :  { %785 = vmatprep.mubr.msk.bf16.mxu0 %vm905_vm0, %v904_v0  ;;  %770 = vmatpush3.bf16.msra.mxu0 %v822_v44 }
 0x1b6   :  { %771 = vmatprep.subr.bf16.mxu0 %v904_v0 }
 0x1b9   :  { %772 = vmatpush3.bf16.msra.mxu0 %v823_v45 }
 0x1ba   :  { %773 = vmatprep.subr.bf16.mxu0 %v904_v0 }
 0x1bd   :  { %774 = vmatpush3.bf16.msra.mxu0 %v824_v46 }
 0x1be   :  { %775 = vmatprep.subr.bf16.mxu0 %v904_v0 }
 0x1c1   :  { %776 = vmatpush3.bf16.msra.mxu0 %v825_v47 }
 0x1c2   :  { %777 = vmatprep.subr.bf16.mxu0 %v904_v0 }
 0x1c5   :  { %778 = vmatpush3.bf16.msra.mxu0 %v826_v48 }
 0x1c6   :  { %779 = vmatprep.subr.bf16.mxu0 %v904_v0 }
 0x1c9   :  { %780 = vmatpush3.bf16.msra.mxu0 %v827_v49 }
 0x1ca   :  { %781 = vmatprep.subr.bf16.mxu0 %v904_v0 }
 0x1cd   :  { %782 = vmatpush3.bf16.msra.mxu0 %v828_v58 }
 0x1ce   :  { %783 = vmatprep.subr.bf16.mxu0 %v904_v0  ;;  %v653_v0 = vld [vmem:[%s1110_s10] ss:$0 sm:$0xff]  ;;  %s874_s10 = scalar_lea.vmem %s613_s9, 128 }
 0x1cf   :  { %p875_p10 = scmp.ne.s32.totalorder %s613_s9, %s874_s10  ;;  %p880_p12 = scmp.lt.s32.totalorder %s874_s10, %s874_s10 }
 0x1d1   :  { %784 = vmatpush3.bf16.msra.mxu0 %v829_v59  ;;  %p881_p13 = por %p880_p12, %p879_p11 }
 0x1d3   :  { %p882_p0 = pnand %p881_p13, %p875_p10 }
 0x274   :  { %v356_v51 = vpop.f32.mrf.mxu0 }
 0x275   :  { %v357_v52 = vadd.f32 %v635_v50, %v356_v51 }
 0x276   :  { %v747_v53 = vpop.f32.mrf.mxu0 }
 0x277   :  { %v362_v54 = vmax.f32 %v357_v52, 0.0 }
 0x278   :  { %v359_v55 = vpop.f32.mrf.mxu0 }
 0x279   :  { %v363_v56 = vpack.c.bf16 %v362_v54, %v362_v54 }
 0x27a   :  { %v748_v57 = vpop.f32.mrf.mxu0 }
 0x27b   :  { %766 = vmatmul.mubr.bf16.vlgmr.msra.gmra.mxu1 %v363_v56 }
 0x33b   :  { %v469_v61 = vpop.f32.mrf.mxu1 }
 0x33c   :  { %v470_v62 = vadd.f32 %v644_v60, %v469_v61 }
 0x33d   :  { %v767_v63 = vpop.f32.mrf.mxu1 }
 0x33e   :  { %v475_v1 = vmax.f32 %v470_v62, 0.0 }
 0x33f   :  { %v472_v2 = vpop.f32.mrf.mxu1 }
 0x340   :  { %v476_v3 = vpack.c.bf16 %v475_v1, %v475_v1 }
 0x341   :  { %v768_v4 = vpop.f32.mrf.mxu1 }
 0x342   :  { %786 = vmatmul.mubr.bf16.vlgmr.msra.gmra.mxu0 %v476_v3 }
 0x402   :  { %v582_v5 = vpop.f32.mrf.mxu0 }
 0x403   :  { %v583_v6 = vadd.f32 %v653_v0, %v582_v5 }
 0x404   :  { %v787_v7 = vpop.f32.mrf.mxu0 }
 0x405   :  { %601 = vrot.lane.b32.xlu1 %v583_v6, %s901_s20  ;;  %v589_v8 = vsel %vm588_vm2, %v583_v6, -inf }
 0x406   :  { %590 = vmax.xlane.f32.xlu0 %v589_v8  ;;  %v585_v9 = vpop.f32.mrf.mxu0 }
 0x408   :  { %v788_v10 = vpop.f32.mrf.mxu0 }
 0x477   :  { %v602_v19 = vpop.permute.xlu1 %601 }
 0x48f   :  { %v591_v11 = vpop.xlane.xlu0 %590 }
 0x490   :  { %v592_v12 = vsub.f32 %v583_v6, %v591_v11 }
 0x492   :  { %v593_v13 = vmul.f32 1.442695, %v592_v12 }
 0x494   :  { %830 = vpow2.f32 %v593_v13 }
 0x4a1   :  { %v831_v14 = vpop.eup %830 }
 0x4a2   :  { %v595_v15 = vsel %vm588_vm2, %v831_v14, 0.0 }
 0x4a3   :  { %596 = vadd.xlane.f32.xlu0 %v595_v15 }
 0x52c   :  { %v597_v16 = vpop.xlane.xlu0 %596 }
 0x52d   :  { %832 = vrcp.f32 %v597_v16 }
 0x53a   :  { %v833_v17 = vpop.eup %832 }
 0x53b   :  { %v599_v18 = vmul.f32 %v833_v17, %v831_v14 }
 0x53d   :  { %v604_v20 = vsel %vm588_vm2, %v599_v18, %v602_v19 }
 0x53e   :  { %605 = vst [vmem:[#allocation7] sm:$0xff] %v604_v20 }
 0x53f   :  { %885 = shalt.err (!%p882_p0)
}
 0x540   :  { %615 = dma.vmem_to_hbm [thread:$0]  %s613_s9, 128, %s1111_s11, [#allocation4]  }
 0x541   :  { %898 = dma.done.wait [#allocation4], 128  }
 0x542   :  { %899 = vsyncadd [#allocation4], 4294967168 }
 0x543   :  { %619 = vsyncpa [#allocation3], 1 }
 0x544   :  { %620 = vsyncpa [#allocation6], 1 }
 0x545   :  { %621 = vsyncpa [#allocation4], 1 }

</bundles_post_ra>
